<compile_context>
chip_gen: v7x
topology: tpu7x:2x2x1
jax: 0.10.0
libtpu: 0.0.40
codegen_flags: <defaults>
</compile_context>

<pallas_src>
import jax
import jax.numpy as jnp
from jax.experimental import pallas as pl
from jax.experimental.pallas import tpu as pltpu

IN_DIM, H1, H2, LATENT = 140, 32, 16, 8
XE_DIM = IN_DIM + LATENT          # packed [x | eps] input width


def _vae_kernel(
    xe_ref,                                                   # [x | eps] bf16
    w1_ref, b1_ref, w2_ref, b2_ref,                           # encoder
    wml_ref, bml_ref,                                         # fused mean|logvar head (f32)
    wd1_ref, bd1_ref, wd2_ref, bd2_ref, wd3_ref, bd3_ref,     # decoder
    dec_ref, ml_ref,                                          # outputs
):
    xe = xe_ref[...]                                # (TB, 148) bf16
    x = xe[:, :IN_DIM]                              # bf16 MXU operand
    eps = xe[:, IN_DIM:].astype(jnp.float32)        # U[0,1) noise

    # --- encoder: Linear(140,32)+ReLU, Linear(32,16)+ReLU (bf16 MXU, f32 acc) ---
    h1 = jnp.dot(x, w1_ref[...], preferred_element_type=jnp.float32) + b1_ref[...]
    h1 = jnp.maximum(h1, 0.0).astype(jnp.bfloat16)
    h2 = jnp.dot(h1, w2_ref[...], preferred_element_type=jnp.float32) + b2_ref[...]
    h2 = jnp.maximum(h2, 0.0)                       # stays f32 for the latent heads

    # --- fused latent heads, f32 (tiny 16x16 matmul; keeps mean/logvar tight) ---
    ml = jnp.dot(h2, wml_ref[...], preferred_element_type=jnp.float32) + bml_ref[...]
    mean = ml[:, :LATENT]
    logvar = ml[:, LATENT:]

    # --- reparameterize (f32): std = exp(0.5*logvar); eps ~ U[0,1) (torch.rand_like) ---
    std = jnp.exp(0.5 * logvar)
    latent = (mean + std * eps).astype(jnp.bfloat16)

    # --- decoder: Linear(8,16)+ReLU, Linear(16,32)+ReLU, Linear(32,140)+Sigmoid ---
    d1 = jnp.dot(latent, wd1_ref[...], preferred_element_type=jnp.float32) + bd1_ref[...]
    d1 = jnp.maximum(d1, 0.0).astype(jnp.bfloat16)
    d2 = jnp.dot(d1, wd2_ref[...], preferred_element_type=jnp.float32) + bd2_ref[...]
    d2 = jnp.maximum(d2, 0.0).astype(jnp.bfloat16)
    d3 = jnp.dot(d2, wd3_ref[...], preferred_element_type=jnp.float32) + bd3_ref[...]
    decoded = jax.nn.sigmoid(d3)

    dec_ref[...] = decoded.astype(dec_ref.dtype)
    ml_ref[...] = ml.astype(ml_ref.dtype)


def init_params(key):
    """Deterministic parameter init. Weights stored pre-transposed as
    (in_features, out_features) so the kernel does plain x @ W + b, matching
    PyTorch's y = x @ weight.T + bias semantics."""
    dims = [
        (IN_DIM, H1), (H1, H2),                 # encoder
        (H2, LATENT), (H2, LATENT),             # mean, logvar
        (LATENT, H2), (H2, H1), (H1, IN_DIM),   # decoder
    ]
    params = []
    for i, (fan_in, fan_out) in enumerate(dims):
        kw, kb = jax.random.split(jax.random.fold_in(key, i))
        bound = 1.0 / jnp.sqrt(fan_in)
        w = jax.random.uniform(kw, (fan_in, fan_out), jnp.float32, -bound, bound)
        b = jax.random.uniform(kb, (1, fan_out), jnp.float32, -bound, bound)
        params += [w, b]
    return params


def prepare_kernel_params(params):
    """Fuse mean|logvar head weights into one (16, 16) matmul (kept f32 for
    accuracy of mean/logvar) and pre-cast the large matmul weights to bf16
    (halves weight DMA bytes); biases stay f32."""
    (w1, b1, w2, b2, wm, bm, wv, bv, wd1, bd1, wd2, bd2, wd3, bd3) = params
    wml = jnp.concatenate([wm, wv], axis=1)      # (H2, 2*LATENT), f32
    bml = jnp.concatenate([bm, bv], axis=1)      # (1, 2*LATENT), f32
    bf = lambda w: w.astype(jnp.bfloat16)
    return [bf(w1), b1, bf(w2), b2, wml, bml,
            bf(wd1), bd1, bf(wd2), bd2, bf(wd3), bd3]


def _round_up(n, m):
    return ((n + m - 1) // m) * m


def autoencoder_forward(x, eps, params, *, tb=4096):
    """Batch-tiled fused VAE forward.

    tb = max rows per grid step; actual tile is a multiple of 16 and, when B is
    large enough, chosen so the grid has >= 2 steps (keeps both v7x TCs busy).
    """
    B = x.shape[0]
    kparams = prepare_kernel_params(params)

    # Pack [x | eps] and pre-cast to bf16: x was cast to bf16 before the MXU
    # anyway, so this halves the dominant input DMA bytes for free and drops
    # the lane-sparse eps input stream.
    xe = jnp.concatenate([x, eps], axis=1).astype(jnp.bfloat16)   # (B, 148)

    TB = max(16, min(tb, _round_up(pl.cdiv(B, 2), 16)))
    grid = (pl.cdiv(B, TB),)

    def row_spec(n):
        return pl.BlockSpec((TB, n), lambda i: (i, 0))

    def resident_spec(a):
        # full-block, same block every grid step -> stays VMEM-resident
        return pl.BlockSpec(a.shape, lambda i: (0, 0))

    in_specs = [row_spec(XE_DIM)] + [resident_spec(p) for p in kparams]
    out_specs = (row_spec(IN_DIM), row_spec(2 * LATENT))
    out_shapes = (
        jax.ShapeDtypeStruct((B, IN_DIM), jnp.float32),       # decoded
        jax.ShapeDtypeStruct((B, 2 * LATENT), jnp.float32),   # mean | logvar slab
    )

    flops = 2 * B * (IN_DIM * H1 + H1 * H2 + H2 * 2 * LATENT
                     + LATENT * H2 + H2 * H1 + H1 * IN_DIM)
    transcendentals = B * (LATENT + IN_DIM)      # exp in reparam + sigmoid
    bytes_accessed = (xe.size * xe.dtype.itemsize
                      + sum(int(p.size) * p.dtype.itemsize for p in kparams)
                      + B * IN_DIM * 4 + B * 2 * LATENT * 4)

    dec, ml = pl.pallas_call(
        _vae_kernel,
        grid=grid,
        out_shape=out_shapes,
        in_specs=in_specs,
        out_specs=out_specs,
        compiler_params=pltpu.CompilerParams(
            dimension_semantics=("parallel",),
            vmem_limit_bytes=48 * 1024 * 1024,   # v5e default is 16 MiB; large tiles need headroom
        ),
        cost_estimate=pl.CostEstimate(flops=flops,
                                      transcendentals=transcendentals,
                                      bytes_accessed=bytes_accessed),
    )(xe, *kparams)

    return dec, ml[:, :LATENT], ml[:, LATENT:]


def reference_forward(x, eps, params):
    (w1, b1, w2, b2, wm, bm, wv, bv, wd1, bd1, wd2, bd2, wd3, bd3) = params
    h = jnp.maximum(x @ w1 + b1, 0.0)
    h = jnp.maximum(h @ w2 + b2, 0.0)
    mean = h @ wm + bm
    logvar = h @ wv + bv
    latent = mean + jnp.exp(0.5 * logvar) * eps
    d = jnp.maximum(latent @ wd1 + bd1, 0.0)
    d = jnp.maximum(d @ wd2 + bd2, 0.0)
    decoded = jax.nn.sigmoid(d @ wd3 + bd3)
    return decoded, mean, logvar


if __name__ == "__main__":
    key = jax.random.PRNGKey(0)
    k_x, k_eps, k_p = jax.random.split(key, 3)

    # Small batch chosen to exercise the batch grid (2 steps of 16, last one
    # partial -> verifies padded-row clipping on writeback).
    B = 20
    x = jax.random.normal(k_x, (B, IN_DIM), jnp.float32)
    # Spec uses torch.rand_like -> uniform [0,1); generated outside the kernel
    # for determinism / reproducibility.
    eps = jax.random.uniform(k_eps, (B, LATENT), jnp.float32)
    params = init_params(k_p)

    decoded, mean, logvar = autoencoder_forward(x, eps, params, tb=16)
    jax.block_until_ready((decoded, mean, logvar))

    # Sanity-check against pure-JAX f32 reference (bf16 matmul operands ->
    # loosened tolerance vs. an exact-f32 path).
    ref_dec, ref_mean, ref_logvar = reference_forward(x, eps, params)
    assert decoded.shape == (B, IN_DIM)
    assert mean.shape == (B, LATENT) and logvar.shape == (B, LATENT)
    assert jnp.allclose(decoded, ref_dec, atol=5e-2, rtol=5e-2)
    assert jnp.allclose(mean, ref_mean, atol=5e-2, rtol=5e-2)
    assert jnp.allclose(logvar, ref_logvar, atol=5e-2, rtol=5e-2)

    print("KERNEL_OK")
</pallas_src>

<mosaic_0001>
module attributes {stable_mosaic.version = 11 : i64} {
  func.func @_vae_kernel(%arg0: i32, %arg1: memref<16x148xbf16, #tpu.memory_space<vmem>>, %arg2: memref<140x32xbf16, #tpu.memory_space<vmem>>, %arg3: memref<1x32xf32, #tpu.memory_space<vmem>>, %arg4: memref<32x16xbf16, #tpu.memory_space<vmem>>, %arg5: memref<1x16xf32, #tpu.memory_space<vmem>>, %arg6: memref<16x16xf32, #tpu.memory_space<vmem>>, %arg7: memref<1x16xf32, #tpu.memory_space<vmem>>, %arg8: memref<8x16xbf16, #tpu.memory_space<vmem>>, %arg9: memref<1x16xf32, #tpu.memory_space<vmem>>, %arg10: memref<16x32xbf16, #tpu.memory_space<vmem>>, %arg11: memref<1x32xf32, #tpu.memory_space<vmem>>, %arg12: memref<32x140xbf16, #tpu.memory_space<vmem>>, %arg13: memref<1x140xf32, #tpu.memory_space<vmem>>, %arg14: memref<16x140xf32, #tpu.memory_space<vmem>>, %arg15: memref<16x16xf32, #tpu.memory_space<vmem>>) attributes {dimension_semantics = [#tpu.dimension_semantics<parallel>], iteration_bounds = array<i64: 2>, scalar_prefetch = 0 : i64, scratch_operands = 0 : i64, tpu.core_type = #tpu.core_type<tc>, window_params = [{transform_indices = @transform_0, window_bounds = array<i64: 16, 148>}, {pipeline_mode = #tpu.pipeline_mode<synchronous>, transform_indices = @transform_1, window_bounds = array<i64: 140, 32>}, {pipeline_mode = #tpu.pipeline_mode<synchronous>, transform_indices = @transform_2, window_bounds = array<i64: 1, 32>}, {pipeline_mode = #tpu.pipeline_mode<synchronous>, transform_indices = @transform_3, window_bounds = array<i64: 32, 16>}, {pipeline_mode = #tpu.pipeline_mode<synchronous>, transform_indices = @transform_4, window_bounds = array<i64: 1, 16>}, {pipeline_mode = #tpu.pipeline_mode<synchronous>, transform_indices = @transform_5, window_bounds = array<i64: 16, 16>}, {pipeline_mode = #tpu.pipeline_mode<synchronous>, transform_indices = @transform_6, window_bounds = array<i64: 1, 16>}, {pipeline_mode = #tpu.pipeline_mode<synchronous>, transform_indices = @transform_7, window_bounds = array<i64: 8, 16>}, {pipeline_mode = #tpu.pipeline_mode<synchronous>, transform_indices = @transform_8, window_bounds = array<i64: 1, 16>}, {pipeline_mode = #tpu.pipeline_mode<synchronous>, transform_indices = @transform_9, window_bounds = array<i64: 16, 32>}, {pipeline_mode = #tpu.pipeline_mode<synchronous>, transform_indices = @transform_10, window_bounds = array<i64: 1, 32>}, {pipeline_mode = #tpu.pipeline_mode<synchronous>, transform_indices = @transform_11, window_bounds = array<i64: 32, 140>}, {pipeline_mode = #tpu.pipeline_mode<synchronous>, transform_indices = @transform_12, window_bounds = array<i64: 1, 140>}, {transform_indices = @transform_13, window_bounds = array<i64: 16, 140>}, {transform_indices = @transform_14, window_bounds = array<i64: 16, 16>}]} {
    %c0 = arith.constant 0 : index
    %c0_0 = arith.constant 0 : index
    %0 = vector.load %arg1[%c0, %c0_0] : memref<16x148xbf16, #tpu.memory_space<vmem>>, vector<16x148xbf16>
    %1 = vector.extract_strided_slice %0 {offsets = [0, 0], sizes = [16, 140], strides = [1, 1]} : vector<16x148xbf16> to vector<16x140xbf16>
    %2 = vector.extract_strided_slice %0 {offsets = [0, 140], sizes = [16, 8], strides = [1, 1]} : vector<16x148xbf16> to vector<16x8xbf16>
    %3 = arith.extf %2 : vector<16x8xbf16> to vector<16x8xf32>
    %c0_1 = arith.constant 0 : index
    %c0_2 = arith.constant 0 : index
    %4 = vector.load %arg2[%c0_1, %c0_2] : memref<140x32xbf16, #tpu.memory_space<vmem>>, vector<140x32xbf16>
    %cst = arith.constant dense<0.000000e+00> : vector<16x32xf32>
    %5 = tpu.matmul %1, %4, %cst {dimension_numbers = #tpu.dot_dimension_numbers<[1], [0], [0], [1], [0, 0, 1, 1], [], []>} : vector<16x140xbf16>, vector<140x32xbf16>, vector<16x32xf32> -> vector<16x32xf32>
    %c0_3 = arith.constant 0 : index
    %c0_4 = arith.constant 0 : index
    %6 = vector.load %arg3[%c0_3, %c0_4] : memref<1x32xf32, #tpu.memory_space<vmem>>, vector<1x32xf32>
    %7 = vector.broadcast %6 : vector<1x32xf32> to vector<16x32xf32>
    %8 = arith.addf %5, %7 : vector<16x32xf32>
    %cst_5 = arith.constant 0.000000e+00 : f32
    %9 = vector.broadcast %cst_5 : f32 to vector<16x32xf32>
    %10 = arith.maximumf %8, %9 : vector<16x32xf32>
    %11 = arith.truncf %10 : vector<16x32xf32> to vector<16x32xbf16>
    %c0_6 = arith.constant 0 : index
    %c0_7 = arith.constant 0 : index
    %12 = vector.load %arg4[%c0_6, %c0_7] : memref<32x16xbf16, #tpu.memory_space<vmem>>, vector<32x16xbf16>
    %cst_8 = arith.constant dense<0.000000e+00> : vector<16x16xf32>
    %13 = tpu.matmul %11, %12, %cst_8 {dimension_numbers = #tpu.dot_dimension_numbers<[1], [0], [0], [1], [0, 0, 1, 1], [], []>} : vector<16x32xbf16>, vector<32x16xbf16>, vector<16x16xf32> -> vector<16x16xf32>
    %c0_9 = arith.constant 0 : index
    %c0_10 = arith.constant 0 : index
    %14 = vector.load %arg5[%c0_9, %c0_10] : memref<1x16xf32, #tpu.memory_space<vmem>>, vector<1x16xf32>
    %15 = vector.broadcast %14 : vector<1x16xf32> to vector<16x16xf32>
    %16 = arith.addf %13, %15 : vector<16x16xf32>
    %cst_11 = arith.constant 0.000000e+00 : f32
    %17 = vector.broadcast %cst_11 : f32 to vector<16x16xf32>
    %18 = arith.maximumf %16, %17 : vector<16x16xf32>
    %c0_12 = arith.constant 0 : index
    %c0_13 = arith.constant 0 : index
    %19 = vector.load %arg6[%c0_12, %c0_13] : memref<16x16xf32, #tpu.memory_space<vmem>>, vector<16x16xf32>
    %cst_14 = arith.constant dense<0.000000e+00> : vector<16x16xf32>
    %20 = tpu.matmul %18, %19, %cst_14 {dimension_numbers = #tpu.dot_dimension_numbers<[1], [0], [0], [1], [0, 0, 1, 1], [], []>} : vector<16x16xf32>, vector<16x16xf32>, vector<16x16xf32> -> vector<16x16xf32>
    %c0_15 = arith.constant 0 : index
    %c0_16 = arith.constant 0 : index
    %21 = vector.load %arg7[%c0_15, %c0_16] : memref<1x16xf32, #tpu.memory_space<vmem>>, vector<1x16xf32>
    %22 = vector.broadcast %21 : vector<1x16xf32> to vector<16x16xf32>
    %23 = arith.addf %20, %22 : vector<16x16xf32>
    %24 = vector.extract_strided_slice %23 {offsets = [0, 0], sizes = [16, 8], strides = [1, 1]} : vector<16x16xf32> to vector<16x8xf32>
    %25 = vector.extract_strided_slice %23 {offsets = [0, 8], sizes = [16, 8], strides = [1, 1]} : vector<16x16xf32> to vector<16x8xf32>
    %cst_17 = arith.constant 5.000000e-01 : f32
    %26 = vector.broadcast %cst_17 : f32 to vector<16x8xf32>
    %27 = arith.mulf %26, %25 : vector<16x8xf32>
    %28 = math.exp %27 : vector<16x8xf32>
    %29 = arith.mulf %28, %3 : vector<16x8xf32>
    %30 = arith.addf %24, %29 : vector<16x8xf32>
    %31 = arith.truncf %30 : vector<16x8xf32> to vector<16x8xbf16>
    %c0_18 = arith.constant 0 : index
    %c0_19 = arith.constant 0 : index
    %32 = vector.load %arg8[%c0_18, %c0_19] : memref<8x16xbf16, #tpu.memory_space<vmem>>, vector<8x16xbf16>
    %cst_20 = arith.constant dense<0.000000e+00> : vector<16x16xf32>
    %33 = tpu.matmul %31, %32, %cst_20 {dimension_numbers = #tpu.dot_dimension_numbers<[1], [0], [0], [1], [0, 0, 1, 1], [], []>} : vector<16x8xbf16>, vector<8x16xbf16>, vector<16x16xf32> -> vector<16x16xf32>
    %c0_21 = arith.constant 0 : index
    %c0_22 = arith.constant 0 : index
    %34 = vector.load %arg9[%c0_21, %c0_22] : memref<1x16xf32, #tpu.memory_space<vmem>>, vector<1x16xf32>
    %35 = vector.broadcast %34 : vector<1x16xf32> to vector<16x16xf32>
    %36 = arith.addf %33, %35 : vector<16x16xf32>
    %cst_23 = arith.constant 0.000000e+00 : f32
    %37 = vector.broadcast %cst_23 : f32 to vector<16x16xf32>
    %38 = arith.maximumf %36, %37 : vector<16x16xf32>
    %39 = arith.truncf %38 : vector<16x16xf32> to vector<16x16xbf16>
    %c0_24 = arith.constant 0 : index
    %c0_25 = arith.constant 0 : index
    %40 = vector.load %arg10[%c0_24, %c0_25] : memref<16x32xbf16, #tpu.memory_space<vmem>>, vector<16x32xbf16>
    %cst_26 = arith.constant dense<0.000000e+00> : vector<16x32xf32>
    %41 = tpu.matmul %39, %40, %cst_26 {dimension_numbers = #tpu.dot_dimension_numbers<[1], [0], [0], [1], [0, 0, 1, 1], [], []>} : vector<16x16xbf16>, vector<16x32xbf16>, vector<16x32xf32> -> vector<16x32xf32>
    %c0_27 = arith.constant 0 : index
    %c0_28 = arith.constant 0 : index
    %42 = vector.load %arg11[%c0_27, %c0_28] : memref<1x32xf32, #tpu.memory_space<vmem>>, vector<1x32xf32>
    %43 = vector.broadcast %42 : vector<1x32xf32> to vector<16x32xf32>
    %44 = arith.addf %41, %43 : vector<16x32xf32>
    %cst_29 = arith.constant 0.000000e+00 : f32
    %45 = vector.broadcast %cst_29 : f32 to vector<16x32xf32>
    %46 = arith.maximumf %44, %45 : vector<16x32xf32>
    %47 = arith.truncf %46 : vector<16x32xf32> to vector<16x32xbf16>
    %c0_30 = arith.constant 0 : index
    %c0_31 = arith.constant 0 : index
    %48 = vector.load %arg12[%c0_30, %c0_31] : memref<32x140xbf16, #tpu.memory_space<vmem>>, vector<32x140xbf16>
    %cst_32 = arith.constant dense<0.000000e+00> : vector<16x140xf32>
    %49 = tpu.matmul %47, %48, %cst_32 {dimension_numbers = #tpu.dot_dimension_numbers<[1], [0], [0], [1], [0, 0, 1, 1], [], []>} : vector<16x32xbf16>, vector<32x140xbf16>, vector<16x140xf32> -> vector<16x140xf32>
    %c0_33 = arith.constant 0 : index
    %c0_34 = arith.constant 0 : index
    %50 = vector.load %arg13[%c0_33, %c0_34] : memref<1x140xf32, #tpu.memory_space<vmem>>, vector<1x140xf32>
    %51 = vector.broadcast %50 : vector<1x140xf32> to vector<16x140xf32>
    %52 = arith.addf %49, %51 : vector<16x140xf32>
    %53 = arith.negf %52 : vector<16x140xf32>
    %54 = math.exp %53 : vector<16x140xf32>
    %cst_35 = arith.constant 1.000000e+00 : f32
    %55 = vector.broadcast %cst_35 : f32 to vector<16x140xf32>
    %56 = arith.addf %55, %54 : vector<16x140xf32>
    %57 = arith.divf %55, %56 : vector<16x140xf32>
    %c0_36 = arith.constant 0 : index
    %c0_37 = arith.constant 0 : index
    %58 = vector.load %arg14[%c0_36, %c0_37] : memref<16x140xf32, #tpu.memory_space<vmem>>, vector<16x140xf32>
    tpu.vector_store %arg14[%c0_36, %c0_37], %57 {strides = array<i32>} : memref<16x140xf32, #tpu.memory_space<vmem>>, vector<16x140xf32>,
    %c0_38 = arith.constant 0 : index
    %c0_39 = arith.constant 0 : index
    %59 = vector.load %arg15[%c0_38, %c0_39] : memref<16x16xf32, #tpu.memory_space<vmem>>, vector<16x16xf32>
    tpu.vector_store %arg15[%c0_38, %c0_39], %23 {strides = array<i32>} : memref<16x16xf32, #tpu.memory_space<vmem>>, vector<16x16xf32>,
    return
  }
  func.func @transform_0(%arg0: i32) -> (i32, i32) {
    %c0_i32 = arith.constant 0 : i32
    %c0_i32_0 = arith.constant 0 : i32
    return %arg0, %c0_i32 : i32, i32
  }
  func.func @transform_1(%arg0: i32) -> (i32, i32) {
    %c0_i32 = arith.constant 0 : i32
    %c0_i32_0 = arith.constant 0 : i32
    %c0_i32_1 = arith.constant 0 : i32
    return %c0_i32, %c0_i32_0 : i32, i32
  }
  func.func @transform_2(%arg0: i32) -> (i32, i32) {
    %c0_i32 = arith.constant 0 : i32
    %c0_i32_0 = arith.constant 0 : i32
    %c0_i32_1 = arith.constant 0 : i32
    return %c0_i32, %c0_i32_0 : i32, i32
  }
  func.func @transform_3(%arg0: i32) -> (i32, i32) {
    %c0_i32 = arith.constant 0 : i32
    %c0_i32_0 = arith.constant 0 : i32
    %c0_i32_1 = arith.constant 0 : i32
    return %c0_i32, %c0_i32_0 : i32, i32
  }
  func.func @transform_4(%arg0: i32) -> (i32, i32) {
    %c0_i32 = arith.constant 0 : i32
    %c0_i32_0 = arith.constant 0 : i32
    %c0_i32_1 = arith.constant 0 : i32
    return %c0_i32, %c0_i32_0 : i32, i32
  }
  func.func @transform_5(%arg0: i32) -> (i32, i32) {
    %c0_i32 = arith.constant 0 : i32
    %c0_i32_0 = arith.constant 0 : i32
    %c0_i32_1 = arith.constant 0 : i32
    return %c0_i32, %c0_i32_0 : i32, i32
  }
  func.func @transform_6(%arg0: i32) -> (i32, i32) {
    %c0_i32 = arith.constant 0 : i32
    %c0_i32_0 = arith.constant 0 : i32
    %c0_i32_1 = arith.constant 0 : i32
    return %c0_i32, %c0_i32_0 : i32, i32
  }
  func.func @transform_7(%arg0: i32) -> (i32, i32) {
    %c0_i32 = arith.constant 0 : i32
    %c0_i32_0 = arith.constant 0 : i32
    %c0_i32_1 = arith.constant 0 : i32
    return %c0_i32, %c0_i32_0 : i32, i32
  }
  func.func @transform_8(%arg0: i32) -> (i32, i32) {
    %c0_i32 = arith.constant 0 : i32
    %c0_i32_0 = arith.constant 0 : i32
    %c0_i32_1 = arith.constant 0 : i32
    return %c0_i32, %c0_i32_0 : i32, i32
  }
  func.func @transform_9(%arg0: i32) -> (i32, i32) {
    %c0_i32 = arith.constant 0 : i32
    %c0_i32_0 = arith.constant 0 : i32
    %c0_i32_1 = arith.constant 0 : i32
    return %c0_i32, %c0_i32_0 : i32, i32
  }
  func.func @transform_10(%arg0: i32) -> (i32, i32) {
    %c0_i32 = arith.constant 0 : i32
    %c0_i32_0 = arith.constant 0 : i32
    %c0_i32_1 = arith.constant 0 : i32
    return %c0_i32, %c0_i32_0 : i32, i32
  }
  func.func @transform_11(%arg0: i32) -> (i32, i32) {
    %c0_i32 = arith.constant 0 : i32
    %c0_i32_0 = arith.constant 0 : i32
    %c0_i32_1 = arith.constant 0 : i32
    return %c0_i32, %c0_i32_0 : i32, i32
  }
  func.func @transform_12(%arg0: i32) -> (i32, i32) {
    %c0_i32 = arith.constant 0 : i32
    %c0_i32_0 = arith.constant 0 : i32
    %c0_i32_1 = arith.constant 0 : i32
    return %c0_i32, %c0_i32_0 : i32, i32
  }
  func.func @transform_13(%arg0: i32) -> (i32, i32) {
    %c0_i32 = arith.constant 0 : i32
    %c0_i32_0 = arith.constant 0 : i32
    return %arg0, %c0_i32 : i32, i32
  }
  func.func @transform_14(%arg0: i32) -> (i32, i32) {
    %c0_i32 = arith.constant 0 : i32
    %c0_i32_0 = arith.constant 0 : i32
    return %arg0, %c0_i32 : i32, i32
  }
}

</mosaic_0001>

<bundles_post_ra>
// kernel: tpu_custom_call.1
= control target key start
LH: loop header
LB: loop body
LE: loop exit
PB: predicated region body
PF: predicated region fallthrough
CT: control target
= control target key end

     0   :  { %s2115_s0 = inlined_call_operand.vmem [shape: bf16[20,148], index: 0, kind: input, shape index: {}]   ;;  %s2116_s1 = inlined_call_operand.vmem [shape: bf16[140,32], index: 1, kind: input, shape index: {}]   ;;  %s2117_s2 = inlined_call_operand.vmem [shape: f32[1,32], index: 2, kind: input, shape index: {}]   ;;  %s2118_s3 = inlined_call_operand.vmem [shape: bf16[32,16], index: 3, kind: input, shape index: {}]   ;;  %s2119_s4 = inlined_call_operand.vmem [shape: f32[1,16], index: 4, kind: input, shape index: {}]   ;;  %s2120_s5 = inlined_call_operand.vmem [shape: f32[16,16], index: 5, kind: input, shape index: {}]   ;;  %s2121_s6 = inlined_call_operand.vmem [shape: f32[1,16], index: 6, kind: input, shape index: {}]   ;;  %s2122_s7 = inlined_call_operand.vmem [shape: bf16[8,16], index: 7, kind: input, shape index: {}]   ;;  %s2123_s8 = inlined_call_operand.vmem [shape: f32[1,16], index: 8, kind: input, shape index: {}]   ;;  %s2124_s9 = inlined_call_operand.vmem [shape: bf16[16,32], index: 9, kind: input, shape index: {}]   ;;  %s2125_s10 = inlined_call_operand.vmem [shape: f32[1,32], index: 10, kind: input, shape index: {}]   ;;  %s2126_s11 = inlined_call_operand.vmem [shape: bf16[32,140], index: 11, kind: input, shape index: {}]   ;;  %s2127_s12 = inlined_call_operand.vmem [shape: f32[1,140], index: 12, kind: input, shape index: {}]   ;;  %s2128_s13 = inlined_call_operand.hbm [shape: f32[20,140], index: 13, kind: output, shape index: {0}]   ;;  %s2129_s14 = inlined_call_operand.vmem [shape: f32[20,16], index: 14, kind: output, shape index: {1}]  }
   0x1   :  { %2134 = sst [smem:[#allocation9_spill]] %s2115_s0 }
   0x2   :  { %2135 = sst [smem:[#allocation10_spill]] %s2116_s1 }
   0x3   :  { %2136 = sst [smem:[#allocation11_spill]] %s2117_s2 }
   0x4   :  { %2137 = sst [smem:[#allocation12_spill]] %s2118_s3 }
   0x5   :  { %2138 = sst [smem:[#allocation13_spill]] %s2119_s4 }
   0x6   :  { %20 = vsyncpa [#allocation3], 0 }
   0x7   :  { %22 = vsyncpa [#allocation3 + $0x1], 0  ;;  %s1853_s29 = smov 0   ;;  %s1855_s30 = smov 0  }
   0x8   :  { %s1857_s15 = smov 0   ;;  %s1859_s16 = smov 0  }
   0x9 LB: > { %2139 = sst [smem:[#allocation6_spill]] %s1731_s15  ;;  %s1874_s17 = sadd.s32 4294967295, %s1735_s16   ;;  %s1735_s16 = sphi %s1859_s16, %s2150_s16   ;;  %s1731_s15 = sphi %s1857_s15, %s2152_s15   ;;  %s1727_s30 = sphi %s1855_s30, %s2154_s30   ;;  %s1723_s29 = sphi %s1853_s29, %s2153_s29  }
   0xa   : > { %s1368_s18 = sadd.s32 4294967294, %s1735_s16   ;;  %s1878_s19 = sadd.s32 1, %s1735_s16  }
   0xb   : > { %2140 = sst [smem:[#allocation7_spill]] %s1878_s19  ;;  %s313_s20 = sadd.s32 1, %s1731_s15 }
   0xc   : > { %s310_s21 = ssub.s32 %s1735_s16, %s1878_s19  ;;  %p323_p0 = scmp.ne.s32.totalorder %s1731_s15, %s1727_s30 }
   0xd   : > { %p311_p1 = scmp.eq.s32.totalorder %s310_s21, 0  ;;  %p324_p2 = scmp.eq.s32.totalorder %s1874_s17, 1 }
   0xe   : > { %p329_p3 = scmp.ne.s32.totalorder %s1727_s30, %s1723_s29  ;;  %p330_p4 = scmp.eq.s32.totalorder %s1368_s18, 1 }
   0xf   : > { %s1889_s22 = scalar_select %p311_p1, %s1731_s15, %s313_s20  }
  0x10   : > { %p1891_p5 = por %p324_p2, %p323_p0  ;;  %p1895_p6 = por %p330_p4, %p329_p3 }
  0x11   : > { %2141 = sst [smem:[#allocation8_spill]] %s1889_s22  ;;  %p1371_p7 = scmp.ge.s32.totalorder %s1735_s16, 1 }
  0x12   : > { %p430_p8 = scmp.lt.s32.totalorder %s1735_s16, 3 }
  0x14   : > { %p431_p9 = pnand %p1371_p7, %p430_p8 }
  0x15   : > { %s2144_s1 = sld [smem:[#allocation10_spill]] (!%p431_p9)  ;;  %v1769_v1 = vmov (!%p431_p9), 0   ;;  %s1909_s18 = sshll.u32 (!%p431_p9), %s1874_s17, 1  ;;  %vm614_vm0 = vcmask (!%p431_p9), 97280   ;;  %vm618_vm1 = vcmask (!%p431_p9), 1045504   ;;  %v1770_v16 = vmov (!%p431_p9), 0.0  }
  0x16   : > { %434 = sbr.rel (%p431_p9) target bundleno = 1621 (0x655), region = 72  ;;  %622 = vmatprep.subr.bf16.mxu0 (!%p431_p9), %v1769_v1  ;;  %p492_p10 = scmp.lt.s32.totalorder (!%p431_p9), %s1909_s18, 2  ;;  %1455 = vmatprep.subr.bf16.mxu1 (!%p431_p9), %v1770_v16  ;;  %vm1771_vm2 = vmmov (!%p431_p9), 0   ;;  %v736_v18 = vld [vmem:[%s2120_s5] sm:$0xff] (!%p431_p9)  ;;  %v737_v19 = vld [vmem:[%s2120_s5 + $0x8] sm:$0xff] (!%p431_p9)  ;;  %vm689_vm3 = vcmask (!%p431_p9), 261120  }
  0x17   : > { %s2145_s0 = sld [smem:[#allocation9_spill]] (!%p431_p9)  ;;  %s2146_s3 = sld [smem:[#allocation12_spill]] (!%p431_p9)  ;;  %1459 = vmatprep.mubr.msk.bf16.mxu1 (!%p431_p9), %vm1771_vm2, %v1770_v16  ;;  %v1482_v20 = vpack.c.bf16 (!%p431_p9), %v737_v19, %v736_v18  ;;  %vm745_vm4 = vcmask (!%p431_p9), 130048   ;;  %v1394_v47 = vld [vmem:[%s2121_s6] ss:$0 sm:$0xff] (!%p431_p9)  ;;  %vm866_vm5 = vcmask (!%p431_p9), 1043456  }
  0x18   : > { %s1772_s21 = smov (!%p431_p9), 116   ;;  %s2147_s2 = sld [smem:[#allocation11_spill]] (!%p431_p9)  ;;  %v854_v56 = vld [vmem:[%s2122_s7] sm:$0xf] (!%p431_p9)  ;;  %vm862_vm6 = vcmask (!%p431_p9), 64512  }
  0x19   : > { %s1773_s19 = smov (!%p431_p9), 8   ;;  %s2148_s4 = sld [smem:[#allocation13_spill]] (!%p431_p9)  ;;  %v868_v57 = vsel (!%p431_p9), %vm866_vm5, %v854_v56, 0  ;;  %v1615_v19 = vld [vmem:[%s2126_s11] ss:$8 sps:$4 sm:$0xff] (!%p431_p9)  }
  0x1a   : > { %s1774_s22 = smov (!%p431_p9), 120  }
  0x1b   : > { %v1601_v0 = vld [vmem:[%s2144_s1] sm:$0xff] (!%p431_p9)   ;;  %v1602_v2 = vld [vmem:[%s2144_s1 + $0x8] sm:$0xff] (!%p431_p9)   ;;  %v1603_v3 = vld [vmem:[%s2144_s1 + $0x10] sm:$0xff] (!%p431_p9)  }
  0x1c   : > { %623 = vmatpush1.bf16.msra.mxu0 (!%p431_p9), %v1601_v0  ;;  %v1604_v4 = vld [vmem:[%s2144_s1 + $0x18] sm:$0xff] (!%p431_p9)   ;;  %v1605_v8 = vld [vmem:[%s2144_s1 + $0x20] sm:$0xff] (!%p431_p9)   ;;  %v1606_v9 = vld [vmem:[%s2144_s1 + $0x28] sm:$0xff] (!%p431_p9)  }
  0x1d   : > { %624 = vmatprep.subr.bf16.mxu0 %v1769_v1  ;;  %s493_s20 = scalar_select %p492_p10, %s1909_s18, 2  ;;  %v1607_v10 = vld [vmem:[%s2144_s1 + $0x30] sm:$0xff]   ;;  %v1608_v11 = vld [vmem:[%s2144_s1 + $0x38] sm:$0xff]   ;;  %v1609_v12 = vld [vmem:[%s2144_s1 + $0x40] sm:$0x3f]  }
  0x1e   : > { %v620_v13 = vsel %vm618_vm1, %v1609_v12, 0  ;;  %v1612_v15 = vld [vmem:[%s2146_s3] sm:$0xff]   ;;  %v1613_v17 = vld [vmem:[%s2146_s3 + $0x8] sm:$0xff]  }
  0x1f   : > { %s1437_s26 = sshll.u32 %s493_s20, 3  ;;  %1456 = vmatpush3.bf16.msra.mxu1 %v1612_v15  ;;  %v1377_v21 = vld [vmem:[%s2147_s2] ss:$0 sm:$0xff] }
  0x20   : > { %625 = vmatpush1.bf16.msra.mxu0 %v1602_v2  ;;  %s496_s27 = scalar_lea.vmem %s2145_s0, %s1437_s26  ;;  %1457 = vmatprep.subr.bf16.mxu1 %v1770_v16  ;;  %v1390_v38 = vld [vmem:[%s2148_s4] ss:$0 sm:$0xff]  ;;  %s1975_s26 = sand.u32 1, %s1727_s30  }
  0x21   : > { %626 = vmatprep.subr.bf16.mxu0 %v1769_v1  ;;  %v515_v5 = vld [vmem:[%s496_s27] sm:$0xff]  ;;  %v516_v6 = vld [vmem:[%s496_s27 + $0x8] sm:$0xff]  ;;  %s1373_s27 = sshll.u32 %s1975_s26, 4  ;;  %s1372_s1 = sshll.u32 %s1975_s26, 5 }
  0x22   : > { %v1379_v7 = vcombine.high %v515_v5, %v516_v6  ;;  %v1378_v14 = vcombine.low %v515_v5, %v516_v6  ;;  %519 = vrot.lane.b32.xlu0 %v515_v5, %s1772_s21  ;;  %s1981_s20 = scalar_lea.vmem [#allocation4], %s1373_s27   ;;  %s479_s2 = scalar_lea.vmem [#allocation2], %s1372_s1 }
  0x23   : > { %1458 = vmatpush3.bf16.msra.mxu1 %v1613_v17 }
  0x24   : > { %627 = vmatpush1.bf16.msra.mxu0 %v1603_v3  ;;  %1389 = vmatprep.mubr.msk.bf16.mxu0 %vm614_vm0, %v1379_v7  ;;  %v1614_v7 = vld [vmem:[%s2124_s9] sm:$0xff]  }
  0x25   : > { %628 = vmatprep.subr.bf16.mxu0 %v1769_v1  ;;  %1483 = vmatprep.subr.bf16.mxu1 %v1482_v20 }
  0x26   : > { %521 = vrot.lane.b32.xlu0 %v516_v6, %s1772_s21 }
  0x28   : > { %629 = vmatpush1.bf16.msra.mxu0 %v1604_v4 }
  0x29   : > { %630 = vmatprep.subr.bf16.mxu0 %v1769_v1 }
  0x2c   : > { %631 = vmatpush1.bf16.msra.mxu0 %v1605_v8  ;;  %v1397_v8 = vld [vmem:[%s2123_s8] ss:$0 sm:$0xff] }
  0x2d   : > { %632 = vmatprep.subr.bf16.mxu0 %v1769_v1 }
  0x30   : > { %633 = vmatpush1.bf16.msra.mxu0 %v1606_v9 }
  0x31   : > { %634 = vmatprep.subr.bf16.mxu0 %v1769_v1 }
  0x34   : > { %635 = vmatpush1.bf16.msra.mxu0 %v1607_v10 }
  0x35   : > { %636 = vmatprep.subr.bf16.mxu0 %v1769_v1 }
  0x38   : > { %637 = vmatpush1.bf16.msra.mxu0 %v1608_v11 }
  0x39   : > { %638 = vmatprep.subr.bf16.mxu0 %v1769_v1 }
  0x3c   : > { %639 = vmatpush1.bf16.msra.mxu0 %v620_v13 }
  0x3f   : > { %655 = vmatmul.mubr.bf16.vlgmr.msra.gmra.mrb[0].mxu0 %v1378_v14 }
  0x94   : > { %v520_v31 = vpop.permute.xlu0 %519 }
  0x95   : > { %v523_v32 = vrot.slane %v520_v31, 4  ;;  %v982_v31 = vlaneseq }
  0x97   : > { %v527_v34 = vunpack.c.l.bf16 %v523_v32  ;;  %v983_v32 = vshrl.u32 %v982_v31, 7 }
  0x98   : > { %v522_v33 = vpop.permute.xlu0 %521 }
  0x99   : > { %v524_v35 = vrot.slane %v522_v33, 4  ;;  %v984_v33 = vsub.s32 0, %v983_v32 }
  0x9b   : > { %v528_v36 = vunpack.c.l.bf16 %v524_v35  ;;  %v988_v35 = vsub.s32 1, %v983_v32 }
  0x9d   : > { %v1596_v37 = vpack.i.bf16 %v528_v36, %v527_v34  ;;  %v980_v34 = vld [vmem:[%s2127_s12] sm:$0x3] }
  0x9e   : > { %v985_v36 = vrot.slane %v980_v34, %v984_v33 }
  0x9f   : > { %1597 = vrot.lane.b32.xlu1 %v1596_v37, %s1773_s19  ;;  %v989_v37 = vrot.slane %v980_v34, %v988_v35  ;;  %s2133_s19 = scalar_lea.sflag [#allocation3], %s1975_s26 }
 0x111   : > { %v1598_v58 = vpop.permute.xlu1 %1597 }
 0x112   : > { %v656_v22 = vpop.f32.mrb[0].mxu0  ;;  %v1600_v59 = vunpack.i.h.bf16 %v1598_v58  ;;  %v1599_v61 = vunpack.i.l.bf16 %v1598_v58 }
 0x113   : > { %v657_v23 = vadd.f32 %v1377_v21, %v656_v22  ;;  %v658_v24 = vpop.f32.mrb[1].mxu0 }
 0x114   : > { %v659_v25 = vpop.f32.mrb[2].mxu0 }
 0x115   : > { %v660_v26 = vadd.f32 %v1377_v21, %v659_v25  ;;  %v661_v27 = vpop.f32.mrb[3].mxu0  ;;  %v663_v28 = vmax.f32 %v657_v23, 0.0  ;;  %v1618_v21 = vld [vmem:[%s2126_s11 + $0x10] ss:$8 sps:$4 sm:$0xff]  }
 0x117   : > { %v664_v29 = vmax.f32 %v660_v26, 0.0 }
 0x119   : > { %v665_v30 = vpack.c.bf16 %v664_v29, %v663_v28 }
 0x11b   : > { %1460 = vmatmul.mubr.msk.bf16.vlgmr.msra.gmra.mrb[0].mxu1 %vm689_vm3, %v665_v30 }
 0x11c   : > { %1485 = vmatpush3.bf16.msra.mxu1 %v1482_v20  ;;  %v1620_v20 = vld [vmem:[%s2126_s11 + $0x14] ss:$8 sps:$4 sm:$0xff]  }
 0x11d   : > { %1470 = vmatprep.subr.bf16.mxu1 %v1770_v16 }
 0x1ee   : > { %v727_v39 = vpop.f32.mrb[0].mxu1 }
 0x1ef   : > { %v728_v40 = vadd.f32 %v1390_v38, %v727_v39  ;;  %v1461_v41 = vpop.f32.mrb[1].mxu1 }
 0x1f0   : > { %v730_v42 = vpop.f32.mrb[2].mxu1 }
 0x1f1   : > { %v734_v43 = vmax.f32 %v728_v40, 0.0  ;;  %v731_v44 = vadd.f32 %v1390_v38, %v730_v42  ;;  %v1462_v45 = vpop.f32.mrb[3].mxu1 }
 0x1f3   : > { %v735_v46 = vmax.f32 %v731_v44, 0.0  ;;  %1467 = vmatprep.mubr.msk.f32.mxu1 %vm745_vm4, %v734_v43 }
 0x1f5   : > { %1468 = vmatmul.mubr.msk.f32.vlgmr.msra.gmra.mrb[4].mxu1 %vm745_vm4, %v735_v46 }
 0x1f6   : > { %1472 = vmatprep.mubr.msk.bf16.mxu1 %vm1771_vm2, %v1770_v16  ;;  %1471 = vmatpush3.bf16.msra.mxu1 %v868_v57 }
 0x1f7   : > { %1476 = vmatprep.subr.bf16.mxu1 %v1770_v16 }
 0x2c8   : > { %v1469_v48 = vpop.f32.mrb[4].mxu1 }
 0x2c9   : > { %v824_v49 = vadd.f32 %v1469_v48, %v1394_v47  ;;  %v818_v50 = vpop.f32.mrb[5].mxu1 }
 0x2ca   : > { %v819_v51 = vadd.f32 %v1394_v47, %v818_v50 }
 0x2cb   : > { %v828_v52 = vmul.f32 0.5, %v824_v49  ;;  %1087 = vst.msk [vmem:[%s1981_s20 + $0x8] sm:$0xff] %vm745_vm4, %v824_v49 }
 0x2cc   : > { %v827_v53 = vmul.f32 0.5, %v819_v51  ;;  %1086 = vst.msk [vmem:[%s1981_s20] sm:$0xff] %vm745_vm4, %v819_v51 }
 0x2cd   : > { %v831_v54 = vmul.f32 1.442695, %v828_v52 }
 0x2ce   : > { %v829_v55 = vmul.f32 1.442695, %v827_v53 }
 0x2cf   : > { %1621 = vpow2.f32 %v831_v54 }
 0x2d0   : > { %1623 = vpow2.f32 %v829_v55 }
 0x2d9   : > { %v1622_v60 = vpop.eup %1621 }
 0x2da   : > { %v1624_v62 = vpop.eup %1623  ;;  %v842_v63 = vmul.f32 %v1622_v60, %v1600_v59 }
 0x2db   : > { %v841_v0 = vmul.f32 %v1624_v62, %v1599_v61 }
 0x2dc   : > { %847 = vrot.lane.b32.xlu0 %v842_v63, %s1774_s22 }
 0x2dd   : > { %845 = vrot.lane.b32.xlu1 %v841_v0, %s1774_s22  ;;  %s1101_s22 = ssub.s32 (%p1891_p5), 3, %s1909_s18 }
 0x2de   : > { %p1102_p11 = scmp.lt.s32.totalorder (%p1891_p5), %s1101_s22, 2 }
 0x34e   : > { %v848_v2 = vpop.permute.xlu0 %847 }
 0x34f   : > { %v852_v3 = vadd.f32 %v848_v2, %v824_v49  ;;  %v846_v4 = vpop.permute.xlu1 %845 }
 0x350   : > { %v851_v5 = vadd.f32 %v846_v4, %v819_v51 }
 0x352   : > { %v853_v6 = vpack.c.bf16 %v852_v3, %v851_v5 }
 0x354   : > { %1473 = vmatmul.mubr.msk.bf16.vlgmr.msra.gmra.mrb[8].mxu1 %vm862_vm6, %v853_v6 }
 0x355   : > { %1478 = vmatprep.mubr.msk.bf16.mxu1 %vm1771_vm2, %v1770_v16  ;;  %1477 = vmatpush3.bf16.msra.mxu1 %v1614_v7  ;;  %v1617_v16 = vld [vmem:[%s2126_s11 + $0x4] ss:$8 sps:$4 sm:$0xff]  }
 0x356   : > { %1015 = vmatprep.subr.bf16.mxu1 %v1617_v16 }
 0x427   : > { %v904_v9 = vpop.f32.mrb[8].mxu1 }
 0x428   : > { %v905_v10 = vadd.f32 %v1397_v8, %v904_v9  ;;  %v1474_v11 = vpop.f32.mrb[9].mxu1 }
 0x429   : > { %v907_v12 = vpop.f32.mrb[10].mxu1 }
 0x42a   : > { %v908_v13 = vadd.f32 %v1397_v8, %v907_v12  ;;  %v1475_v14 = vpop.f32.mrb[11].mxu1  ;;  %v911_v15 = vmax.f32 %v905_v10, 0.0 }
 0x42c   : > { %v912_v17 = vmax.f32 %v908_v13, 0.0 }
 0x42e   : > { %v913_v18 = vpack.c.bf16 %v912_v17, %v911_v15 }
 0x430   : > { %1479 = vmatmul.mubr.msk.bf16.vlgmr.msra.gmra.mrb[12].mxu1 %vm745_vm4, %v913_v18 }
 0x431   : > { %1047 = vmatprep.mubr.bf16.mxu1 %v1769_v1  ;;  %1016 = vmatpush1.bf16.msra.mxu1 %v1615_v19  ;;  %v1399_v1 = vld [vmem:[%s2125_s10] ss:$0 sm:$0xff] }
 0x432   : > { %1017 = vmatprep.subr.bf16.mxu1 %v1620_v20 }
 0x435   : > { %1018 = vmatpush1.bf16.msra.mxu1 %v1618_v21 }
 0x503   : > { %v966_v22 = vpop.f32.mrb[12].mxu1 }
 0x504   : > { %v967_v23 = vadd.f32 %v1399_v1, %v966_v22  ;;  %v1480_v24 = vpop.f32.mrb[13].mxu1 }
 0x505   : > { %v969_v25 = vpop.f32.mrb[14].mxu1 }
 0x506   : > { %v970_v26 = vadd.f32 %v1399_v1, %v969_v25  ;;  %v1481_v27 = vpop.f32.mrb[15].mxu1  ;;  %v973_v28 = vmax.f32 %v967_v23, 0.0 }
 0x508   : > { %v974_v29 = vmax.f32 %v970_v26, 0.0 }
 0x50a   : > { %v975_v30 = vpack.c.bf16 %v974_v29, %v973_v28 }
 0x50c   : > { %1406 = vmatmul.mubr.msk.bf16.vlgmr.msra.gmra.mrb[16].mxu1 %vm689_vm3, %v975_v30 }
 0x5df   : > { %v1049_v38 = vpop.f32.mrb[16].mxu1 }
 0x5e0   : > { %v1050_v39 = vadd.f32 %v1049_v38, %v985_v36  ;;  %v1051_v40 = vpop.f32.mrb[17].mxu1 }
 0x5e1   : > { %v1052_v41 = vadd.f32 %v1051_v40, %v989_v37  ;;  %v1053_v42 = vpop.f32.mrb[18].mxu1 }
 0x5e2   : > { %v1407_v43 = vmul.f32 -1.442695, %v1050_v39  ;;  %v1054_v44 = vadd.f32 %v1053_v42, %v985_v36  ;;  %v1055_v45 = vpop.f32.mrb[19].mxu1 }
 0x5e3   : > { %v1408_v46 = vmul.f32 -1.442695, %v1052_v41  ;;  %v1056_v47 = vadd.f32 %v1055_v45, %v989_v37 }
 0x5e4   : > { %1625 = vpow2.f32 %v1407_v43  ;;  %v1409_v48 = vmul.f32 -1.442695, %v1054_v44 }
 0x5e5   : > { %1627 = vpow2.f32 %v1408_v46  ;;  %v1410_v49 = vmul.f32 -1.442695, %v1056_v47 }
 0x5e6   : > { %1629 = vpow2.f32 %v1409_v48 }
 0x5e7   : > { %1631 = vpow2.f32 %v1410_v49 }
 0x5ee   : > { %v1626_v50 = vpop.eup %1625 }
 0x5ef   : > { %v1628_v51 = vpop.eup %1627  ;;  %v1070_v52 = vadd.f32 1.0, %v1626_v50 }
 0x5f0   : > { %v1630_v53 = vpop.eup %1629  ;;  %v1071_v54 = vadd.f32 1.0, %v1628_v51 }
 0x5f1   : > { %v1632_v55 = vpop.eup %1631  ;;  %1633 = vrcp.f32 %v1070_v52  ;;  %v1072_v56 = vadd.f32 1.0, %v1630_v53 }
 0x5f2   : > { %1635 = vrcp.f32 %v1071_v54  ;;  %v1073_v57 = vadd.f32 1.0, %v1632_v55 }
 0x5f3   : > { %1637 = vrcp.f32 %v1072_v56 }
 0x5f4   : > { %1639 = vrcp.f32 %v1073_v57 }
 0x5f9   : > { %1099 = sbr.rel (!%p1891_p5) target bundleno = 1565 (0x61d), region = 76 }
 0x5fb   : > { %v1634_v58 = vpop.eup %1633 }
 0x5fc   : > { %v1636_v59 = vpop.eup %1635  ;;  %1082 = vst [vmem:[%s479_s2] sm:$0xff] %v1634_v58 }
 0x5fd   : > { %v1638_v60 = vpop.eup %1637  ;;  %1083 = vst.msk [vmem:[%s479_s2 + $0x8] sm:$0xff] %vm614_vm0, %v1636_v59 }
 0x5fe   : > { %v1640_v61 = vpop.eup %1639  ;;  %1084 = vst [vmem:[%s479_s2 + $0x10] sm:$0xff] %v1638_v60 }
 0x5ff   : > { %1085 = vst.msk [vmem:[%s479_s2 + $0x18] sm:$0xff] %vm614_vm0, %v1640_v61 }
 0x600   : > { %s2156_s22 = smov (!%p1102_p11, %s1101_s22), 2 }
 0x601   : > { %s2027_s25 = sshll.u32 %s2156_s22, 8 }
 0x602   : > { %s1107_s27 = ssub.s32 512, %s2027_s25 }
 0x603   : > { %1108 = vsyncadd %s2133_s19, %s1107_s27  ;;  %p1416_p12 = scmp.ne.s32.totalorder %s2027_s25, 0  ;;  %s1440_s28 = sshll.u32 %s1874_s17, 9 }
 0x604   : > { %s2037_s15 = scalar_lea.hbm %s2128_s13, %s1440_s28  ;;  %s1114_s1 = sshll.u32 %s479_s2, 4  ;;  %s2039_s1 = int_to_ptr.vmem [resolvable:$true] %s1114_s1 }
 0x605   : > { %s1641_s22 = scalar_lea.vmem %s2039_s1, %s2027_s25  ;;  %s1775_s27 = smov [#allocation2]  }
 0x606   : > { %p1642_p13 = scmp.ne.s32.totalorder %s2039_s1, %s1641_s22  ;;  %s1645_s19 = sshll.u32 %s1775_s27, 4  ;;  %s1646_s19 = int_to_ptr.vmem [resolvable:$false] %s1645_s19 }
 0x607   : > { %s1647_s3 = scalar_lea.vmem %s1646_s19, 1024  ;;  %p1648_p2 = scmp.lt.s32.totalorder %s2039_s1, %s1646_s19 }
 0x608   : > { %p1643_p0 = pnand %p1642_p13, %p1416_p12  ;;  %p1649_p3 = scmp.lt.s32.totalorder %s1647_s3, %s1641_s22 }
 0x60a   : > { %p1644_p1 = pneg %p1643_p0  ;;  %p1650_p4 = por %p1649_p3, %p1648_p2 }
 0x60c   : > { %p1651_p7 = pnand %p1650_p4, %p1644_p1 }
 0x60e   : > { %1654 = shalt.err (!%p1651_p7)
}
 0x60f   : > { %s1655_s2 = scalar_lea.hbm %s2037_s15, %s2027_s25  ;;  %s1659_s0 = scalar_lea.hbm %s2128_s13, 768 }
 0x610   : > { %p1656_p8 = scmp.ne.s32.totalorder %s2037_s15, %s1655_s2  ;;  %p1660_p11 = scmp.lt.u32.totalorder %s2037_s15, %s2128_s13 }
 0x611   : > { %p1661_p13 = scmp.lt.u32.totalorder %s1659_s0, %s1655_s2  ;;  %p1663_p1 = scmp.lt.u32.totalorder %s1655_s2, %s2037_s15 }
 0x612   : > { %p1657_p9 = pnand %p1656_p8, %p1416_p12 }
 0x613   : > { %p1662_p0 = por %p1661_p13, %p1660_p11 }
 0x614   : > { %p1658_p10 = pneg %p1657_p9 }
 0x615   : > { %p1664_p2 = por %p1663_p1, %p1662_p0 }
 0x617   : > { %p1665_p3 = pnand %p1664_p2, %p1658_p10 }
 0x619   : > { %1668 = shalt.err (!%p1665_p3)
}
 0x61a   : > { %s1776_s22 = smov 256   ;;  %s1777_s27 = smov 16  }
 0x61b   : > { %s2149_s28 = scalar_lea.sflag [#allocation3], %s1975_s26 }
 0x61c   : > { %1120 = dma.vmem_to_hbm [thread:$0]  (%p1416_p12), %s2039_s1, %s2027_s25, %s2037_s15, %s2149_s28, %s1776_s22, %s1776_s22, %s1777_s27  }
 0x61d PF: > { %1123 = sbr.rel (!%p1891_p5) target bundleno = 1621 (0x655), region = 80  ;;  %s1125_s2 = ssub.s32 (%p1891_p5), 3, %s1909_s18 }
 0x61e   : > { %s1441_s21 = sshll.u32 (%p1891_p5), %s1874_s17, 4  ;;  %p1126_p4 = scmp.lt.s32.totalorder (%p1891_p5), %s1125_s2, 2 }
 0x61f   : > { %s2074_s3 = scalar_lea.vmem (%p1891_p5), %s2129_s14, %s1441_s21  }
 0x624   : > { %s2158_s2 = smov (!%p1126_p4, %s1125_s2), 2 }
 0x625   : > { %s1422_s4 = sshll.u32 %s2158_s2, 7 }
 0x626   : > { %p1425_p7 = scmp.eq.s32.totalorder %s1422_s4, 0 }
 0x627   : > { %s2080_s26 = sshrl.u32 (!%p1425_p7), %s2158_s2, 1 }
 0x628   : > { %1134 = sbr.rel (%p1425_p7) target bundleno = 1621 (0x655), region = 84  ;;  %p1426_p5 = scmp.le.s32.totalorder (!%p1425_p7), %s2080_s26, 0 }
 0x62f   : > { %1315 = sbr.rel (%p1426_p5) target bundleno = 1600 (0x640), region = 173  ;;  %s1737_s17 = smov (!%p1426_p5), %s2074_s3  }
 0x630   : > { %s1741_s23 = smov (!%p1426_p5), %s1981_s20   ;;  %s1745_s18 = smov (!%p1426_p5), 0  }
 0x631   : > { %s1749_s25 = smov (!%p1426_p5), 0  }
 0x636 LB: >> { %v1198_v62 = vld [vmem:[%s1743_s23] sm:$0xff]  ;;  %v1200_v63 = vld [vmem:[%s1743_s23 + $0x8] sm:$0xff]  ;;  %s1202_s4 = sadd.s32 1, %s1747_s18  ;;  %s1192_s25 = sadd.s32 1, %s1751_s25   ;;  %s1751_s25 = sphi %s1749_s25, %s1192_s25   ;;  %s1747_s18 = sphi %s1745_s18, %s1746_s18   ;;  %s1743_s23 = sphi %s1741_s23, %s1207_s23   ;;  %s1739_s17 = sphi %s1737_s17, %s1208_s17  }
 0x637   : >> { %1199 = vst [vmem:[%s1739_s17] sm:$0xff] %v1198_v62  ;;  %1201 = vst [vmem:[%s1739_s17 + $0x8] sm:$0xff] %v1200_v63  ;;  %p1203_p12 = scmp.ge.s32.totalorder %s1202_s4, %s2080_s26  ;;  %p1191_p8 = scmp.ge.s32.totalorder %s1192_s25, %s2080_s26 }
 0x639   : >> { %s2160_s4 = smov (%p1203_p12, %s1202_s4), 0  ;;  %1194 = sbr.rel (!%p1191_p8) target bundleno = 1590 (0x636), region = 179 }
 0x63a   : >> { %s1427_s15 = sshll.u32 %s2160_s4, 4  ;;  %s1746_s18 = smov %s2160_s4  }
 0x63b   : >> { %s1207_s23 = scalar_lea.vmem %s1981_s20, %s1427_s15 [#allocation4]   ;;  %s1208_s17 = scalar_lea.vmem %s2074_s3, %s1427_s15  }
 0x640 PF: > { %s2090_s1 = sand.u32 1, %s2158_s2   ;;  %s1442_s22 = sshll.u32 %s2080_s26, 4 }
 0x641   : > { %s1213_s27 = scalar_lea.vmem %s1981_s20, %s1442_s22 [#allocation4]   ;;  %s1215_s28 = scalar_lea.vmem %s2074_s3, %s1442_s22  }
 0x642   : > { %p1432_p9 = scmp.le.s32.totalorder %s2090_s1, 0 }
 0x643   : > { %s1753_s21 = smov (!%p1432_p9), %s1215_s28   ;;  %s1757_s0 = smov (!%p1432_p9), %s1213_s27  }
 0x644   : > { %1329 = sbr.rel (%p1432_p9) target bundleno = 1621 (0x655), region = 184  ;;  %s1761_s19 = smov (!%p1432_p9), 0  }
 0x645   : > { %s1765_s17 = smov (!%p1432_p9), 0  }
 0x64b LB: >> { %v1225_v0 = vld [vmem:[%s1759_s0] sm:$0xff]  ;;  %s1227_s2 = sadd.s32 1, %s1763_s19  ;;  %s1219_s17 = sadd.s32 1, %s1767_s17   ;;  %s1767_s17 = sphi %s1765_s17, %s1219_s17   ;;  %s1763_s19 = sphi %s1761_s19, %s1762_s19   ;;  %s1759_s0 = sphi %s1757_s0, %s1232_s0   ;;  %s1755_s21 = sphi %s1753_s21, %s1233_s21  }
 0x64c   : >> { %1226 = vst [vmem:[%s1755_s21] sm:$0xff] %v1225_v0  ;;  %p1228_p10 = scmp.ge.s32.totalorder %s1227_s2, %s2090_s1  ;;  %p1218_p11 = scmp.ge.s32.totalorder %s1219_s17, %s2090_s1 }
 0x64e   : >> { %s2162_s2 = smov (%p1228_p10, %s1227_s2), 0  ;;  %1221 = sbr.rel (!%p1218_p11) target bundleno = 1611 (0x64b), region = 190 }
 0x64f   : >> { %s1433_s20 = sshll.u32 %s2162_s2, 3  ;;  %s1762_s19 = smov %s2162_s2  }
 0x650   : >> { %s1232_s0 = scalar_lea.vmem %s1213_s27, %s1433_s20 [#allocation4]   ;;  %s1233_s21 = scalar_lea.vmem %s1215_s28, %s1433_s20  }
 0x655 PF: > { %p1491_p13 = scmp.ge.s32.totalorder %s1735_s16, 2  ;;  %s1245_s3 = sand.u32 1, %s1723_s29  }
 0x656   : > { %s1246_s26 = scalar_lea.sflag [#allocation3], %s1245_s3 }
 0x657   : > { %p1488_p0 = pnand %p1491_p13, %p1895_p6 }
 0x659   : > { %1718 = dma.done.wait (!%p1488_p0), %s1246_s26, 512  }
 0x65a   : > { %1720 = vsyncadd (!%p1488_p0), %s1246_s26, 4294966784  ;;  %s2150_s16 = sld [smem:[#allocation7_spill]]  ;;  %s2151_s23 = sld [smem:[#allocation6_spill]] }
 0x65b   : > { %s2152_s15 = sld [smem:[#allocation8_spill]]  ;;  %s2153_s29 = smov %s1727_s30 }
 0x660   : > { %p25_p1 = scmp.ge.s32.totalorder %s2150_s16, 4   ;;  %s2154_s30 = smov %s2151_s23 }
 0x662   :  { %27 = sbr.rel (!%p25_p1) target bundleno = 9 (0x9), region = 201 }
 0x669   :  { %1258 = vsyncpa [#allocation3], 1 }
 0x66a   :  { %1260 = vsyncpa [#allocation3 + $0x1], 1 }

</bundles_post_ra>
